<compile_context>
chip_gen: v6e
topology: v6e:2x2x1
jax: 0.10.0
libtpu: 0.0.40
codegen_flags: <defaults>
</compile_context>

<pallas_src>
import functools
import math

import jax
import jax.numpy as jnp
from jax import lax
from jax.experimental import pallas as pl
from jax.experimental.pallas import tpu as pltpu

VERY_SMALL_NUMBER = 1e-12


# ---------------------------------------------------------------------------
# Fused Pallas kernel: all AnchorGCN hops for one graph (one grid step)
# ---------------------------------------------------------------------------
def _anchor_gcn_fused_kernel(x_ref, adj_ref, w_ref, out_ref, *,
                             num_layers, nclass):
    # --- prologue: normalize adjacency exactly once (hop-invariant) --------
    adj = adj_ref[0].astype(jnp.float32)                          # [N, A]
    col_sum = jnp.sum(adj, axis=0, keepdims=True)                 # [1, A]
    row_sum = jnp.sum(adj, axis=1, keepdims=True)                 # [N, 1]
    node_norm = adj / jnp.maximum(col_sum, VERY_SMALL_NUMBER)     # [N, A]
    anchor_norm = adj / jnp.maximum(row_sum, VERY_SMALL_NUMBER)   # [N, A]

    # Hop-invariant propagation matrix P = anchor_norm @ node_norm^T  [N, N]
    # (contract over the anchor axis directly; computed once, reused per hop).
    prop = lax.dot_general(
        anchor_norm, node_norm,
        dimension_numbers=(((1,), (1,)), ((), ())),
        preferred_element_type=jnp.float32)                       # [N, N]

    # --- hop loop (static unroll; weights are a padded stacked slab) -------
    h = x_ref[0].astype(jnp.float32)                              # [N, Fm]
    for li in range(num_layers):
        w = w_ref[li]                                             # [Fm, Fm]
        support = jnp.dot(h, w, preferred_element_type=jnp.float32)   # [N, Fm]
        h = jnp.dot(prop, support, preferred_element_type=jnp.float32)
        if li < num_layers - 1:                                   # ReLU between hops
            h = jnp.maximum(h, 0.0)

    out_ref[0] = h[:, :nclass].astype(out_ref.dtype)


def _stack_pad_weights(weights, f_max):
    """Zero-pad each [F_in, F_out] weight to [f_max, f_max] and stack -> [L, Fm, Fm]."""
    padded = []
    for w in weights:
        p = jnp.zeros((f_max, f_max), jnp.float32)
        p = p.at[: w.shape[0], : w.shape[1]].set(w.astype(jnp.float32))
        padded.append(p)
    return jnp.stack(padded, axis=0)


def anchor_gcn_forward(x, node_anchor_adj, weights):
    """Full AnchorGCN forward (bias=False, batch_norm=False, eval-mode dropout).

    Accepts a single graph ([N, F], [N, A]) or a batch ([B, N, F], [B, N, A]).
    """
    squeeze = x.ndim == 2
    if squeeze:
        x = x[None]
        node_anchor_adj = node_anchor_adj[None]

    B, N, _ = x.shape
    A = node_anchor_adj.shape[-1]
    nclass = weights[-1].shape[1]
    num_layers = len(weights)
    f_max = max(max(w.shape) for w in weights)

    # Pad features to the common slab width (zero cols are inert: the padded
    # weight rows beyond F_in are zero).
    x_pad = jnp.zeros((B, N, f_max), jnp.float32).at[:, :, : x.shape[-1]].set(
        x.astype(jnp.float32))
    w_stacked = _stack_pad_weights(weights, f_max)                # [L, Fm, Fm]

    kernel = functools.partial(_anchor_gcn_fused_kernel,
                               num_layers=num_layers, nclass=nclass)

    out = pl.pallas_call(
        kernel,
        out_shape=jax.ShapeDtypeStruct((B, N, nclass), jnp.float32),
        grid=(B,),
        in_specs=[
            pl.BlockSpec((1, N, f_max), lambda b: (b, 0, 0)),
            pl.BlockSpec((1, N, A), lambda b: (b, 0, 0)),
            # Same block for every grid step -> fetched once, reused.
            pl.BlockSpec((num_layers, f_max, f_max), lambda b: (0, 0, 0)),
        ],
        out_specs=pl.BlockSpec((1, N, nclass), lambda b: (b, 0, 0)),
        compiler_params=pltpu.CompilerParams(
            dimension_semantics=("parallel",)),
    )(x_pad, node_anchor_adj.astype(jnp.float32), w_stacked)

    return out[0] if squeeze else out


# ---------------------------------------------------------------------------
# Pure-JAX (f32) reference for sanity checking (matches the PyTorch module)
# ---------------------------------------------------------------------------
def _layer_ref(x, adj, w, relu):
    support = x @ w
    node_norm = adj / jnp.maximum(jnp.sum(adj, axis=-2, keepdims=True),
                                  VERY_SMALL_NUMBER)
    anchor_norm = adj / jnp.maximum(jnp.sum(adj, axis=-1, keepdims=True),
                                    VERY_SMALL_NUMBER)
    out = anchor_norm @ (jnp.swapaxes(node_norm, -1, -2) @ support)
    return jnp.maximum(out, 0.0) if relu else out


def anchor_gcn_ref(x, adj, weights):
    for w in weights[:-1]:
        x = _layer_ref(x, adj, w, True)
    return _layer_ref(x, adj, weights[-1], False)


# ---------------------------------------------------------------------------
def xavier_uniform(key, shape):
    fan_in, fan_out = shape
    bound = math.sqrt(6.0 / (fan_in + fan_out))
    return jax.random.uniform(key, shape, jnp.float32, -bound, bound)


if __name__ == "__main__":
    # Small, module-consistent sizes:
    #   B graphs, N nodes, A anchors, nfeat -> nhid -> nhid -> nclass (3 hops)
    B, N, A = 4, 64, 32
    nfeat, nhid, nclass = 16, 32, 8
    graph_hops = 3

    key = jax.random.PRNGKey(0)
    kx, kadj, *kws = jax.random.split(key, 2 + graph_hops)

    x = jax.random.normal(kx, (B, N, nfeat), jnp.float32)
    # Non-negative, NOT row-normalized adjacency so both normalization paths
    # (node_norm and anchor_norm) are actually exercised.
    node_anchor_adj = jax.random.uniform(
        kadj, (B, N, A), jnp.float32, minval=0.05, maxval=1.0)

    dims = [nfeat] + [nhid] * (graph_hops - 1) + [nclass]
    weights = [xavier_uniform(kws[i], (dims[i], dims[i + 1]))
               for i in range(graph_hops)]

    out = anchor_gcn_forward(x, node_anchor_adj, weights)
    out = jax.block_until_ready(out)

    ref = anchor_gcn_ref(x, node_anchor_adj, weights)
    assert out.shape == (B, N, nclass)
    # All-f32 kernel with exact divides; only the (mathematically equivalent)
    # P = anchor_norm @ node_norm^T re-association changes rounding slightly.
    assert jnp.allclose(out, ref, atol=2e-4, rtol=2e-4), (
        float(jnp.max(jnp.abs(out - ref))))

    print("KERNEL_OK")
</pallas_src>

<mosaic_0001>
module attributes {stable_mosaic.version = 11 : i64} {
  func.func @_anchor_gcn_fused_kernel(%arg0: i32, %arg1: memref<1x64x32xf32, #tpu.memory_space<vmem>>, %arg2: memref<1x64x32xf32, #tpu.memory_space<vmem>>, %arg3: memref<3x32x32xf32, #tpu.memory_space<vmem>>, %arg4: memref<1x64x8xf32, #tpu.memory_space<vmem>>) attributes {dimension_semantics = [#tpu.dimension_semantics<parallel>], iteration_bounds = array<i64: 4>, scalar_prefetch = 0 : i64, scratch_operands = 0 : i64, tpu.core_type = #tpu.core_type<tc>, window_params = [{transform_indices = @transform_0, window_bounds = array<i64: 1, 64, 32>}, {transform_indices = @transform_1, window_bounds = array<i64: 1, 64, 32>}, {pipeline_mode = #tpu.pipeline_mode<synchronous>, transform_indices = @transform_2, window_bounds = array<i64: 3, 32, 32>}, {transform_indices = @transform_3, window_bounds = array<i64: 1, 64, 8>}]} {
    %c0 = arith.constant 0 : index
    %c0_0 = arith.constant 0 : index
    %c0_1 = arith.constant 0 : index
    %0 = vector.load %arg2[%c0, %c0_0, %c0_1] : memref<1x64x32xf32, #tpu.memory_space<vmem>>, vector<1x64x32xf32>
    %1 = vector.shape_cast %0 : vector<1x64x32xf32> to vector<64x32xf32>
    %cst = arith.constant dense<0.000000e+00> : vector<32xf32>
    %2 = vector.multi_reduction <add>, %1, %cst [0] : vector<64x32xf32> to vector<32xf32>
    %3 = vector.shape_cast %2 : vector<32xf32> to vector<1x32xf32>
    %cst_2 = arith.constant dense<0.000000e+00> : vector<64xf32>
    %4 = vector.multi_reduction <add>, %1, %cst_2 [1] : vector<64x32xf32> to vector<64xf32>
    %5 = vector.shape_cast %4 : vector<64xf32> to vector<64x1xf32>
    %cst_3 = arith.constant 9.99999996E-13 : f32
    %6 = vector.broadcast %cst_3 : f32 to vector<1x32xf32>
    %7 = arith.maximumf %3, %6 : vector<1x32xf32>
    %8 = vector.broadcast %7 : vector<1x32xf32> to vector<64x32xf32>
    %9 = arith.divf %1, %8 : vector<64x32xf32>
    %cst_4 = arith.constant 9.99999996E-13 : f32
    %10 = vector.broadcast %cst_4 : f32 to vector<64x1xf32>
    %11 = arith.maximumf %5, %10 : vector<64x1xf32>
    %12 = vector.broadcast %11 : vector<64x1xf32> to vector<64x32xf32>
    %13 = arith.divf %1, %12 : vector<64x32xf32>
    %cst_5 = arith.constant dense<0.000000e+00> : vector<64x64xf32>
    %14 = tpu.matmul %13, %9, %cst_5 {dimension_numbers = #tpu.dot_dimension_numbers<[1], [1], [0], [0], [0, 0, 1, 0], [], []>} : vector<64x32xf32>, vector<64x32xf32>, vector<64x64xf32> -> vector<64x64xf32>
    %c0_6 = arith.constant 0 : index
    %c0_7 = arith.constant 0 : index
    %c0_8 = arith.constant 0 : index
    %15 = vector.load %arg1[%c0_6, %c0_7, %c0_8] : memref<1x64x32xf32, #tpu.memory_space<vmem>>, vector<1x64x32xf32>
    %16 = vector.shape_cast %15 : vector<1x64x32xf32> to vector<64x32xf32>
    %c0_9 = arith.constant 0 : index
    %c0_10 = arith.constant 0 : index
    %c0_11 = arith.constant 0 : index
    %17 = vector.load %arg3[%c0_9, %c0_10, %c0_11] : memref<3x32x32xf32, #tpu.memory_space<vmem>>, vector<1x32x32xf32>
    %18 = vector.shape_cast %17 : vector<1x32x32xf32> to vector<32x32xf32>
    %cst_12 = arith.constant dense<0.000000e+00> : vector<64x32xf32>
    %19 = tpu.matmul %16, %18, %cst_12 {dimension_numbers = #tpu.dot_dimension_numbers<[1], [0], [0], [1], [0, 0, 1, 1], [], []>} : vector<64x32xf32>, vector<32x32xf32>, vector<64x32xf32> -> vector<64x32xf32>
    %cst_13 = arith.constant dense<0.000000e+00> : vector<64x32xf32>
    %20 = tpu.matmul %14, %19, %cst_13 {dimension_numbers = #tpu.dot_dimension_numbers<[1], [0], [0], [1], [0, 0, 1, 1], [], []>} : vector<64x64xf32>, vector<64x32xf32>, vector<64x32xf32> -> vector<64x32xf32>
    %cst_14 = arith.constant 0.000000e+00 : f32
    %21 = vector.broadcast %cst_14 : f32 to vector<64x32xf32>
    %22 = arith.maximumf %20, %21 : vector<64x32xf32>
    %c1 = arith.constant 1 : index
    %c0_15 = arith.constant 0 : index
    %c0_16 = arith.constant 0 : index
    %23 = vector.load %arg3[%c1, %c0_15, %c0_16] : memref<3x32x32xf32, #tpu.memory_space<vmem>>, vector<1x32x32xf32>
    %24 = vector.shape_cast %23 : vector<1x32x32xf32> to vector<32x32xf32>
    %cst_17 = arith.constant dense<0.000000e+00> : vector<64x32xf32>
    %25 = tpu.matmul %22, %24, %cst_17 {dimension_numbers = #tpu.dot_dimension_numbers<[1], [0], [0], [1], [0, 0, 1, 1], [], []>} : vector<64x32xf32>, vector<32x32xf32>, vector<64x32xf32> -> vector<64x32xf32>
    %cst_18 = arith.constant dense<0.000000e+00> : vector<64x32xf32>
    %26 = tpu.matmul %14, %25, %cst_18 {dimension_numbers = #tpu.dot_dimension_numbers<[1], [0], [0], [1], [0, 0, 1, 1], [], []>} : vector<64x64xf32>, vector<64x32xf32>, vector<64x32xf32> -> vector<64x32xf32>
    %cst_19 = arith.constant 0.000000e+00 : f32
    %27 = vector.broadcast %cst_19 : f32 to vector<64x32xf32>
    %28 = arith.maximumf %26, %27 : vector<64x32xf32>
    %c2 = arith.constant 2 : index
    %c0_20 = arith.constant 0 : index
    %c0_21 = arith.constant 0 : index
    %29 = vector.load %arg3[%c2, %c0_20, %c0_21] : memref<3x32x32xf32, #tpu.memory_space<vmem>>, vector<1x32x32xf32>
    %30 = vector.shape_cast %29 : vector<1x32x32xf32> to vector<32x32xf32>
    %cst_22 = arith.constant dense<0.000000e+00> : vector<64x32xf32>
    %31 = tpu.matmul %28, %30, %cst_22 {dimension_numbers = #tpu.dot_dimension_numbers<[1], [0], [0], [1], [0, 0, 1, 1], [], []>} : vector<64x32xf32>, vector<32x32xf32>, vector<64x32xf32> -> vector<64x32xf32>
    %cst_23 = arith.constant dense<0.000000e+00> : vector<64x32xf32>
    %32 = tpu.matmul %14, %31, %cst_23 {dimension_numbers = #tpu.dot_dimension_numbers<[1], [0], [0], [1], [0, 0, 1, 1], [], []>} : vector<64x64xf32>, vector<64x32xf32>, vector<64x32xf32> -> vector<64x32xf32>
    %33 = vector.extract_strided_slice %32 {offsets = [0, 0], sizes = [64, 8], strides = [1, 1]} : vector<64x32xf32> to vector<64x8xf32>
    %c0_24 = arith.constant 0 : index
    %c0_25 = arith.constant 0 : index
    %c0_26 = arith.constant 0 : index
    %34 = vector.load %arg4[%c0_24, %c0_25, %c0_26] : memref<1x64x8xf32, #tpu.memory_space<vmem>>, vector<1x64x8xf32>
    %35 = vector.shape_cast %34 : vector<1x64x8xf32> to vector<64x8xf32>
    %36 = vector.shape_cast %33 : vector<64x8xf32> to vector<1x64x8xf32>
    tpu.vector_store %arg4[%c0_24, %c0_25, %c0_26], %36 {strides = array<i32>} : memref<1x64x8xf32, #tpu.memory_space<vmem>>, vector<1x64x8xf32>,
    return
  }
  func.func @transform_0(%arg0: i32) -> (i32, i32, i32) {
    %c0_i32 = arith.constant 0 : i32
    %c0_i32_0 = arith.constant 0 : i32
    %c0_i32_1 = arith.constant 0 : i32
    return %arg0, %c0_i32, %c0_i32_0 : i32, i32, i32
  }
  func.func @transform_1(%arg0: i32) -> (i32, i32, i32) {
    %c0_i32 = arith.constant 0 : i32
    %c0_i32_0 = arith.constant 0 : i32
    %c0_i32_1 = arith.constant 0 : i32
    return %arg0, %c0_i32, %c0_i32_0 : i32, i32, i32
  }
  func.func @transform_2(%arg0: i32) -> (i32, i32, i32) {
    %c0_i32 = arith.constant 0 : i32
    %c0_i32_0 = arith.constant 0 : i32
    %c0_i32_1 = arith.constant 0 : i32
    %c0_i32_2 = arith.constant 0 : i32
    return %c0_i32, %c0_i32_0, %c0_i32_1 : i32, i32, i32
  }
  func.func @transform_3(%arg0: i32) -> (i32, i32, i32) {
    %c0_i32 = arith.constant 0 : i32
    %c0_i32_0 = arith.constant 0 : i32
    %c0_i32_1 = arith.constant 0 : i32
    return %arg0, %c0_i32, %c0_i32_0 : i32, i32, i32
  }
}

</mosaic_0001>

<bundles_post_ra>
// kernel: tpu_custom_call.1
= control target key start
LH: loop header
LB: loop body
LE: loop exit
PB: predicated region body
PF: predicated region fallthrough
CT: control target
= control target key end

     0   :  { %s1695_s12 = smov 0   ;;  %s1944_s0 = inlined_call_operand.vmem [shape: f32[4,64,32], index: 0, kind: input, shape index: {}]   ;;  %s1945_s1 = inlined_call_operand.vmem [shape: f32[4,64,32], index: 1, kind: input, shape index: {}]   ;;  %s1946_s2 = inlined_call_operand.vmem [shape: f32[3,32,32], index: 2, kind: input, shape index: {}]   ;;  %s1947_s3 = inlined_call_operand.vmem [shape: f32[4,64,8], index: 3, kind: output, shape index: {}]  }
   0x1 LB: > { %s1265_s13 = sadd.s32 4294967295, %s1673_s12   ;;  %p1269_p0 = scmp.ge.s32.totalorder %s1673_s12, 1  ;;  %s1673_s12 = sphi %s1695_s12, %s13_s12  }
   0x2   : > { %p147_p1 = scmp.lt.s32.totalorder %s1673_s12, 5 }
   0x4   : > { %p148_p2 = pnand %p1269_p0, %p147_p1 }
   0x5   : > { %p176_p3 = scmp.lt.s32.totalorder (!%p148_p2), %s1265_s13, 3 }
   0x6   : > { %151 = sbr.rel (%p148_p2) target bundleno = 1414 (0x586), region = 32 }
   0xb   : > { %v435_v0 = vld [vmem:[%s1946_s2 + $0x18] sm:$0xff]  ;;  %v434_v1 = vld [vmem:[%s1946_s2 + $0x10] sm:$0xff]  ;;  %s1949_s13 = smov (!%p176_p3, %s1265_s13), 3  ;;  %v433_v2 = vld [vmem:[%s1946_s2 + $0x8] sm:$0xff]  ;;  %vm199_vm0 = vcmask 261120   ;;  %vm565_vm1 = vcmask 523264  }
   0xc   : > { %1481 = vmatprep.subr.mxu1 %v435_v0  ;;  %s1712_s20 = sshll.u32 %s1949_s13, 6  ;;  %v432_v3 = vld [vmem:[%s1946_s2] sm:$0xff]  ;;  %vm1189_vm2 = vcmask 64512  }
   0xd   : > { %1482 = vmatpush3.msra.mxu1 %v435_v0  ;;  %s1721_s25 = scalar_lea.vmem %s1945_s1, %s1712_s20  ;;  %s1727_s28 = scalar_lea.vmem %s1944_s0, %s1712_s20 }
   0xe   : > { %1483 = vmatprep.subr.mxu1 %v434_v1  ;;  %v1730_v4 = vld [vmem:[%s1721_s25] sm:$0xff]  ;;  %v1733_v5 = vld [vmem:[%s1721_s25 + $0x10] sm:$0xff]  ;;  %v1736_v6 = vld [vmem:[%s1721_s25 + $0x8] sm:$0xff]  ;;  %s190_s22 = scalar_lea.vmem %s1947_s3, %s1712_s20 }
   0xf   : > { %1484 = vmatpush3.msra.mxu1 %v434_v1  ;;  %v200_v7 = vsel %vm199_vm0, %v1730_v4, 0.0  ;;  %v203_v8 = vsel %vm199_vm0, %v1733_v5, 0.0  ;;  %v201_v9 = vsel %vm199_vm0, %v1736_v6, 0.0  ;;  %v1745_v10 = vld [vmem:[%s1721_s25 + $0x18] sm:$0xff]  ;;  %v424_v12 = vld [vmem:[%s1727_s28] sm:$0xff]  ;;  %v425_v14 = vld [vmem:[%s1727_s28 + $0x8] sm:$0xff] }
  0x10   : > { %1485 = vmatprep.subr.mxu1 %v433_v2  ;;  %221 = vadd.xlane.f32.xlu0 %v200_v7  ;;  %v202_v11 = vadd.f32 %v201_v9, %v200_v7  ;;  %v205_v13 = vsel %vm199_vm0, %v1745_v10, 0.0  ;;  %v426_v15 = vld [vmem:[%s1727_s28 + $0x10] sm:$0xff]  ;;  %v1754_v17 = vld [vmem:[%s1721_s25 + $0x20] sm:$0xff]  ;;  %v1757_v18 = vld [vmem:[%s1721_s25 + $0x28] sm:$0xff] }
  0x11   : > { %1486 = vmatpush3.msra.mxu1 %v433_v2  ;;  %225 = vadd.xlane.f32.xlu1 %v203_v8  ;;  %v427_v19 = vld [vmem:[%s1727_s28 + $0x18] sm:$0xff]  ;;  %v428_v21 = vld [vmem:[%s1727_s28 + $0x20] sm:$0xff]  ;;  %v207_v22 = vsel %vm199_vm0, %v1754_v17, 0.0  ;;  %v209_v23 = vsel %vm199_vm0, %v1757_v18, 0.0  ;;  %v1768_v25 = vld [vmem:[%s1721_s25 + $0x30] sm:$0xff] }
  0x12   : > { %1487 = vmatprep.subr.mxu1 %v432_v3  ;;  %1489 = vmatprep.mubr.msk.f32.mxu1 %vm199_vm0, %v424_v12  ;;  %v204_v16 = vadd.f32 %v203_v8, %v202_v11  ;;  %v1771_v26 = vld [vmem:[%s1721_s25 + $0x38] sm:$0xff]  ;;  %v429_v27 = vld [vmem:[%s1727_s28 + $0x28] sm:$0xff]  ;;  %v430_v29 = vld [vmem:[%s1727_s28 + $0x30] sm:$0xff]  ;;  %v211_v30 = vsel %vm199_vm0, %v1768_v25, 0.0 }
  0x13   : > { %1488 = vmatpush3.msra.mxu1 %v432_v3  ;;  %v213_v31 = vsel %vm199_vm0, %v1771_v26, 0.0  ;;  %v431_v33 = vld [vmem:[%s1727_s28 + $0x38] sm:$0xff] }
  0x14   : > { %1490 = vmatmul.mubr.msk.f32.vlgmr.msra.gmra.mxu1 %vm199_vm0, %v425_v14  ;;  %223 = vadd.xlane.f32.xlu0 %v201_v9  ;;  %v206_v20 = vadd.f32 %v205_v13, %v204_v16 }
  0x15   : > { %1492 = vmatprep.mubr.msk.f32.mxu1 %vm199_vm0, %v426_v15  ;;  %227 = vadd.xlane.f32.xlu1 %v205_v13 }
  0x16   : > { %v208_v24 = vadd.f32 %v207_v22, %v206_v20 }
  0x18   : > { %1493 = vmatmul.mubr.msk.f32.gmra.mxu1 %vm199_vm0, %v427_v19  ;;  %229 = vadd.xlane.f32.xlu0 %v207_v22  ;;  %v210_v28 = vadd.f32 %v209_v23, %v208_v24 }
  0x19   : > { %1495 = vmatprep.mubr.msk.f32.mxu1 %vm199_vm0, %v428_v21  ;;  %231 = vadd.xlane.f32.xlu1 %v209_v23 }
  0x1a   : > { %v212_v32 = vadd.f32 %v211_v30, %v210_v28 }
  0x1c   : > { %1496 = vmatmul.mubr.msk.f32.gmra.mxu1 %vm199_vm0, %v429_v27  ;;  %233 = vadd.xlane.f32.xlu0 %v211_v30  ;;  %v214_v34 = vadd.f32 %v213_v31, %v212_v32  ;;  %v1310_v30 = vld [vmem:[%s1946_s2 + $0x30] sm:$0xff]  ;;  %v1309_v32 = vld [vmem:[%s1946_s2 + $0x28] sm:$0xff] }
  0x1d   : > { %1498 = vmatprep.mubr.msk.f32.mxu1 %vm199_vm0, %v430_v29  ;;  %235 = vadd.xlane.f32.xlu1 %v213_v31 }
  0x1e   : > { %v215_v35 = vrot.slane %v214_v34, 4 }
  0x20   : > { %1499 = vmatmul.mubr.msk.f32.gmra.mxu1 %vm199_vm0, %v431_v33  ;;  %v216_v36 = vadd.f32 %v215_v35, %v214_v34 }
  0x22   : > { %v217_v37 = vrot.slane %v216_v36, 2 }
  0x24   : > { %v218_v38 = vadd.f32 %v217_v37, %v216_v36 }
  0x26   : > { %v219_v39 = vrot.slane %v218_v38, 1 }
  0x28   : > { %v220_v40 = vadd.f32 %v219_v39, %v218_v38  ;;  %v1308_v38 = vld [vmem:[%s1946_s2 + $0x20] sm:$0xff] }
  0x2a   : > { %v237_v41 = vmax.f32 %v220_v40, 1e-12 }
  0x2c   : > { %1649 = vrcp.f32 %v237_v41 }
  0x39   : > { %v1650_v42 = vpop.eup %1649 }
  0x3a   : > { %v246_v43 = vmul.f32 %v1650_v42, %v1771_v26  ;;  %v245_v44 = vmul.f32 %v1650_v42, %v1768_v25  ;;  %v244_v45 = vmul.f32 %v1650_v42, %v1757_v18  ;;  %v243_v46 = vmul.f32 %v1650_v42, %v1754_v17 }
  0x3b   : > { %v242_v47 = vmul.f32 %v1650_v42, %v1745_v10  ;;  %v241_v48 = vmul.f32 %v1650_v42, %v1733_v5  ;;  %v240_v49 = vmul.f32 %v1650_v42, %v1736_v6  ;;  %v239_v50 = vmul.f32 %v1650_v42, %v1730_v4 }
  0x3c   : > { %1453 = vmatprep.subr.msk.mxu0 %vm199_vm0, %v246_v43 }
  0x3d   : > { %1454 = vmatpush3.xpose.msk.msra.mxu0 %vm199_vm0, %v246_v43 }
  0x3e   : > { %1455 = vmatprep.subr.msk.mxu0 %vm199_vm0, %v245_v44 }
  0x41   : > { %1456 = vmatpush3.xpose.msk.msra.mxu0 %vm199_vm0, %v245_v44 }
  0x42   : > { %1457 = vmatprep.subr.msk.mxu0 %vm199_vm0, %v244_v45 }
  0x45   : > { %1458 = vmatpush3.xpose.msk.msra.mxu0 %vm199_vm0, %v244_v45 }
  0x46   : > { %1459 = vmatprep.subr.msk.mxu0 %vm199_vm0, %v243_v46 }
  0x49   : > { %1460 = vmatpush3.xpose.msk.msra.mxu0 %vm199_vm0, %v243_v46 }
  0x4a   : > { %1461 = vmatprep.subr.msk.mxu0 %vm199_vm0, %v242_v47 }
  0x4d   : > { %1462 = vmatpush3.xpose.msk.msra.mxu0 %vm199_vm0, %v242_v47 }
  0x4e   : > { %1463 = vmatprep.subr.msk.mxu0 %vm199_vm0, %v241_v48 }
  0x51   : > { %1464 = vmatpush3.xpose.msk.msra.mxu0 %vm199_vm0, %v241_v48 }
  0x52   : > { %1465 = vmatprep.subr.msk.mxu0 %vm199_vm0, %v240_v49 }
  0x55   : > { %1466 = vmatpush3.xpose.msk.msra.mxu0 %vm199_vm0, %v240_v49 }
  0x56   : > { %1467 = vmatprep.subr.msk.mxu0 %vm199_vm0, %v239_v50 }
  0x59   : > { %1468 = vmatpush3.xpose.msk.msra.mxu0 %vm199_vm0, %v239_v50 }
  0x99   : > { %v222_v51 = vpop.xlane.xlu0 %221 }
  0x9a   : > { %v226_v52 = vpop.xlane.xlu1 %225  ;;  %v247_v53 = vmax.f32 %v222_v51, 1e-12 }
  0x9b   : > { %v249_v54 = vmax.f32 %v226_v52, 1e-12 }
  0x9c   : > { %1651 = vrcp.f32 %v247_v53 }
  0x9d   : > { %1653 = vrcp.f32 %v249_v54  ;;  %v224_v55 = vpop.xlane.xlu0 %223 }
  0x9e   : > { %v228_v56 = vpop.xlane.xlu1 %227  ;;  %v248_v57 = vmax.f32 %v224_v55, 1e-12  ;;  %v1331_v55 = vld [vmem:[%s1946_s2 + $0x58] sm:$0xff] }
  0x9f   : > { %v250_v58 = vmax.f32 %v228_v56, 1e-12  ;;  %v1330_v56 = vld [vmem:[%s1946_s2 + $0x50] sm:$0xff] }
  0xa0   : > { %1655 = vrcp.f32 %v248_v57  ;;  %v1329_v57 = vld [vmem:[%s1946_s2 + $0x48] sm:$0xff] }
  0xa1   : > { %1657 = vrcp.f32 %v250_v58  ;;  %v230_v59 = vpop.xlane.xlu0 %229 }
  0xa2   : > { %v232_v60 = vpop.xlane.xlu1 %231  ;;  %v251_v61 = vmax.f32 %v230_v59, 1e-12 }
  0xa3   : > { %v252_v62 = vmax.f32 %v232_v60, 1e-12 }
  0xa4   : > { %1659 = vrcp.f32 %v251_v61 }
  0xa5   : > { %1661 = vrcp.f32 %v252_v62  ;;  %v234_v63 = vpop.xlane.xlu0 %233 }
  0xa6   : > { %v236_v0 = vpop.xlane.xlu1 %235  ;;  %v253_v1 = vmax.f32 %v234_v63, 1e-12 }
  0xa7   : > { %v254_v2 = vmax.f32 %v236_v0, 1e-12 }
  0xa8   : > { %1663 = vrcp.f32 %v253_v1 }
  0xa9   : > { %v1652_v3 = vpop.eup %1651  ;;  %1665 = vrcp.f32 %v254_v2  ;;  %v1328_v2 = vld [vmem:[%s1946_s2 + $0x40] sm:$0xff] }
  0xaa   : > { %v1654_v7 = vpop.eup %1653  ;;  %v256_v8 = vmul.f32 %v1652_v3, %v1730_v4 }
  0xab   : > { %v260_v11 = vmul.f32 %v1654_v7, %v1733_v5 }
  0xac   : > { %1469 = vmatprep.mubr.msk.f32.mxu0 %vm199_vm0, %v256_v8 }
  0xad   : > { %v1656_v9 = vpop.eup %1655 }
  0xae   : > { %v1658_v12 = vpop.eup %1657  ;;  %v258_v13 = vmul.f32 %v1656_v9, %v1736_v6 }
  0xaf   : > { %v262_v14 = vmul.f32 %v1658_v12, %v1745_v10 }
  0xb0   : > { %1470 = vmatmul.mubr.msk.f32.vlgmr.msra.gmra.mxu0 %vm199_vm0, %v258_v13 }
  0xb1   : > { %v1660_v15 = vpop.eup %1659  ;;  %1472 = vmatprep.mubr.msk.f32.mxu0 %vm199_vm0, %v260_v11 }
  0xb2   : > { %v1662_v16 = vpop.eup %1661  ;;  %v264_v19 = vmul.f32 %v1660_v15, %v1754_v17 }
  0xb3   : > { %v266_v4 = vmul.f32 %v1662_v16, %v1757_v18 }
  0xb4   : > { %1473 = vmatmul.mubr.msk.f32.gmra.mxu0 %vm199_vm0, %v262_v14 }
  0xb5   : > { %v1664_v20 = vpop.eup %1663  ;;  %1475 = vmatprep.mubr.msk.f32.mxu0 %vm199_vm0, %v264_v19 }
  0xb6   : > { %v1666_v5 = vpop.eup %1665  ;;  %v268_v6 = vmul.f32 %v1664_v20, %v1768_v25  ;;  %v1311_v25 = vld [vmem:[%s1946_s2 + $0x38] sm:$0xff] }
  0xb7   : > { %v270_v10 = vmul.f32 %v1666_v5, %v1771_v26 }
  0xb8   : > { %1476 = vmatmul.mubr.msk.f32.gmra.mxu0 %vm199_vm0, %v266_v4 }
  0xb9   : > { %1478 = vmatprep.mubr.msk.f32.mxu0 %vm199_vm0, %v268_v6 }
  0xbc   : > { %1479 = vmatmul.mubr.msk.f32.gmra.mxu0 %vm199_vm0, %v270_v10 }
  0xd4   : > { %v1491_v21 = vpop.f32.mrf.mxu1 }
  0xd6   : > { %v526_v17 = vpop.f32.mrf.mxu1 }
  0xd8   : > { %v1494_v22 = vpop.f32.mrf.mxu1 }
  0xda   : > { %v536_v23 = vpop.f32.mrf.mxu1 }
  0xdc   : > { %v1497_v24 = vpop.f32.mrf.mxu1 }
  0xde   : > { %v546_v18 = vpop.f32.mrf.mxu1 }
  0xe0   : > { %v1500_v27 = vpop.f32.mrf.mxu1 }
  0xe1   : > { %1501 = vmatprep.subr.mxu1 %v1500_v27 }
  0xe2   : > { %v556_v28 = vpop.f32.mrf.mxu1  ;;  %1502 = vmatpush3.msra.mxu1 %v1500_v27 }
  0xe3   : > { %1503 = vmatprep.subr.mxu1 %v556_v28 }
  0xe4   : > { %1504 = vmatpush3.msra.mxu1 %v556_v28 }
  0xe5   : > { %1505 = vmatprep.subr.mxu1 %v1497_v24 }
  0xe6   : > { %1506 = vmatpush3.msra.mxu1 %v1497_v24 }
  0xe7   : > { %1507 = vmatprep.subr.mxu1 %v546_v18 }
  0xe8   : > { %1508 = vmatpush3.msra.mxu1 %v546_v18 }
  0xe9   : > { %1509 = vmatprep.subr.mxu1 %v1494_v22 }
  0xea   : > { %1510 = vmatpush3.msra.mxu1 %v1494_v22 }
  0xeb   : > { %1511 = vmatprep.subr.mxu1 %v536_v23 }
  0xec   : > { %1512 = vmatpush3.msra.mxu1 %v536_v23 }
  0xed   : > { %1513 = vmatprep.subr.mxu1 %v1491_v21 }
  0xee   : > { %1514 = vmatpush3.msra.mxu1 %v1491_v21 }
  0xef   : > { %1515 = vmatprep.subr.mxu1 %v526_v17 }
  0xf0   : > { %1516 = vmatpush3.msra.mxu1 %v526_v17 }
  0xf1   : > { %1529 = vmatprep.subr.mxu1 %v1311_v25 }
 0x170   : > { %v1828_v26 = vpop.f32.mrf.mxu0 }
 0x172   : > { %v1830_v29 = vpop.f32.mrf.mxu0 }
 0x173   : > { %1517 = vmatprep.mubr.msk.f32.mxu1 %vm565_vm1, %v1830_v29  ;;  %1565 = vmatprep.mubr.msk.f32.mxu0 %vm565_vm1, %v1830_v29 }
 0x174   : > { %v1839_v31 = vpop.f32.mrf.mxu0  ;;  %1518 = vmatmul.mubr.msk.f32.vlgmr.msra.gmra.mxu1 %vm565_vm1, %v1828_v26 }
 0x175   : > { %1530 = vmatpush3.msra.mxu1 %v1311_v25 }
 0x176   : > { %v1846_v33 = vpop.f32.mrf.mxu0  ;;  %1531 = vmatprep.subr.mxu1 %v1310_v30 }
 0x177   : > { %1520 = vmatprep.mubr.msk.f32.mxu1 %vm565_vm1, %v1846_v33  ;;  %1532 = vmatpush3.msra.mxu1 %v1310_v30 }
 0x178   : > { %v1850_v34 = vpop.f32.mrf.mxu0  ;;  %1521 = vmatmul.mubr.msk.f32.gmra.mxu1 %vm565_vm1, %v1839_v31  ;;  %1533 = vmatprep.subr.mxu1 %v1309_v32 }
 0x179   : > { %1534 = vmatpush3.msra.mxu1 %v1309_v32 }
 0x17a   : > { %v1854_v35 = vpop.f32.mrf.mxu0  ;;  %1535 = vmatprep.subr.mxu1 %v1308_v38 }
 0x17b   : > { %1523 = vmatprep.mubr.msk.f32.mxu1 %vm565_vm1, %v1854_v35  ;;  %1536 = vmatpush3.msra.mxu1 %v1308_v38 }
 0x17c   : > { %v1858_v36 = vpop.f32.mrf.mxu0  ;;  %1524 = vmatmul.mubr.msk.f32.gmra.mxu1 %vm565_vm1, %v1850_v34  ;;  %1577 = vmatprep.subr.mxu1 %v1331_v55 }
 0x17e   : > { %v1862_v37 = vpop.f32.mrf.mxu0 }
 0x17f   : > { %1526 = vmatprep.mubr.msk.f32.mxu1 %vm565_vm1, %v1862_v37 }
 0x180   : > { %1527 = vmatmul.mubr.msk.f32.gmra.mxu1 %vm565_vm1, %v1858_v36 }
 0x234   : > { %v1519_v39 = vpop.f32.mrf.mxu1 }
 0x235   : > { %v696_v42 = vmax.f32 %v1519_v39, 0.0 }
 0x236   : > { %v656_v40 = vpop.f32.mrf.mxu1 }
 0x237   : > { %v695_v41 = vmax.f32 %v656_v40, 0.0 }
 0x238   : > { %v1522_v43 = vpop.f32.mrf.mxu1 }
 0x239   : > { %1537 = vmatprep.mubr.msk.f32.mxu1 %vm199_vm0, %v695_v41  ;;  %v698_v46 = vmax.f32 %v1522_v43, 0.0 }
 0x23a   : > { %v666_v44 = vpop.f32.mrf.mxu1  ;;  %1538 = vmatmul.mubr.msk.f32.vlgmr.msra.gmra.mxu1 %vm199_vm0, %v696_v42 }
 0x23b   : > { %v697_v45 = vmax.f32 %v666_v44, 0.0  ;;  %1578 = vmatpush3.msra.mxu1 %v1331_v55 }
 0x23c   : > { %v1525_v47 = vpop.f32.mrf.mxu1  ;;  %1579 = vmatprep.subr.mxu1 %v1330_v56 }
 0x23d   : > { %1540 = vmatprep.mubr.msk.f32.mxu1 %vm199_vm0, %v697_v45  ;;  %v700_v50 = vmax.f32 %v1525_v47, 0.0  ;;  %1580 = vmatpush3.msra.mxu1 %v1330_v56 }
 0x23e   : > { %v676_v48 = vpop.f32.mrf.mxu1  ;;  %1541 = vmatmul.mubr.msk.f32.gmra.mxu1 %vm199_vm0, %v698_v46  ;;  %1581 = vmatprep.subr.mxu1 %v1329_v57 }
 0x23f   : > { %v699_v49 = vmax.f32 %v676_v48, 0.0  ;;  %1582 = vmatpush3.msra.mxu1 %v1329_v57 }
 0x240   : > { %v1528_v51 = vpop.f32.mrf.mxu1  ;;  %1583 = vmatprep.subr.mxu1 %v1328_v2 }
 0x241   : > { %1543 = vmatprep.mubr.msk.f32.mxu1 %vm199_vm0, %v699_v49  ;;  %v702_v54 = vmax.f32 %v1528_v51, 0.0  ;;  %1584 = vmatpush3.msra.mxu1 %v1328_v2 }
 0x242   : > { %v686_v52 = vpop.f32.mrf.mxu1  ;;  %1544 = vmatmul.mubr.msk.f32.gmra.mxu1 %vm199_vm0, %v700_v50 }
 0x243   : > { %v701_v53 = vmax.f32 %v686_v52, 0.0 }
 0x245   : > { %1546 = vmatprep.mubr.msk.f32.mxu1 %vm199_vm0, %v701_v53 }
 0x246   : > { %1547 = vmatmul.mubr.msk.f32.gmra.mxu1 %vm199_vm0, %v702_v54 }
 0x2fa   : > { %v1539_v58 = vpop.f32.mrf.mxu1 }
 0x2fc   : > { %v798_v59 = vpop.f32.mrf.mxu1 }
 0x2fe   : > { %v1542_v60 = vpop.f32.mrf.mxu1 }
 0x300   : > { %v808_v61 = vpop.f32.mrf.mxu1 }
 0x302   : > { %v1545_v62 = vpop.f32.mrf.mxu1 }
 0x304   : > { %v818_v63 = vpop.f32.mrf.mxu1 }
 0x306   : > { %v1548_v0 = vpop.f32.mrf.mxu1 }
 0x307   : > { %1549 = vmatprep.subr.mxu0 %v1548_v0 }
 0x308   : > { %v828_v1 = vpop.f32.mrf.mxu1  ;;  %1550 = vmatpush3.msra.mxu0 %v1548_v0 }
 0x309   : > { %1551 = vmatprep.subr.mxu0 %v828_v1 }
 0x30a   : > { %1552 = vmatpush3.msra.mxu0 %v828_v1 }
 0x30b   : > { %1553 = vmatprep.subr.mxu0 %v1545_v62 }
 0x30c   : > { %1554 = vmatpush3.msra.mxu0 %v1545_v62 }
 0x30d   : > { %1555 = vmatprep.subr.mxu0 %v818_v63 }
 0x30e   : > { %1556 = vmatpush3.msra.mxu0 %v818_v63 }
 0x30f   : > { %1557 = vmatprep.subr.mxu0 %v1542_v60 }
 0x310   : > { %1558 = vmatpush3.msra.mxu0 %v1542_v60 }
 0x311   : > { %1559 = vmatprep.subr.mxu0 %v808_v61 }
 0x312   : > { %1560 = vmatpush3.msra.mxu0 %v808_v61 }
 0x313   : > { %1561 = vmatprep.subr.mxu0 %v1539_v58 }
 0x314   : > { %1562 = vmatpush3.msra.mxu0 %v1539_v58 }
 0x315   : > { %1563 = vmatprep.subr.mxu0 %v798_v59 }
 0x316   : > { %1564 = vmatpush3.msra.mxu0 %v798_v59 }
 0x317   : > { %1566 = vmatmul.mubr.msk.f32.vlgmr.msra.gmra.mxu0 %vm565_vm1, %v1828_v26 }
 0x318   : > { %1568 = vmatprep.mubr.msk.f32.mxu0 %vm565_vm1, %v1846_v33 }
 0x31b   : > { %1569 = vmatmul.mubr.msk.f32.gmra.mxu0 %vm565_vm1, %v1839_v31 }
 0x31c   : > { %1571 = vmatprep.mubr.msk.f32.mxu0 %vm565_vm1, %v1854_v35 }
 0x31f   : > { %1572 = vmatmul.mubr.msk.f32.gmra.mxu0 %vm565_vm1, %v1850_v34 }
 0x320   : > { %1574 = vmatprep.mubr.msk.f32.mxu0 %vm565_vm1, %v1862_v37 }
 0x323   : > { %1575 = vmatmul.mubr.msk.f32.gmra.mxu0 %vm565_vm1, %v1858_v36 }
 0x324   : > { %1613 = vmatprep.mubr.msk.f32.mxu0 %vm565_vm1, %v1830_v29 }
 0x3d7   : > { %v1567_v3 = vpop.f32.mrf.mxu0 }
 0x3d8   : > { %v943_v9 = vmax.f32 %v1567_v3, 0.0 }
 0x3d9   : > { %v903_v7 = vpop.f32.mrf.mxu0 }
 0x3da   : > { %v942_v8 = vmax.f32 %v903_v7, 0.0 }
 0x3db   : > { %v1570_v11 = vpop.f32.mrf.mxu0 }
 0x3dc   : > { %1585 = vmatprep.mubr.msk.f32.mxu1 %vm199_vm0, %v942_v8  ;;  %v945_v14 = vmax.f32 %v1570_v11, 0.0 }
 0x3dd   : > { %v913_v12 = vpop.f32.mrf.mxu0  ;;  %1586 = vmatmul.mubr.msk.f32.vlgmr.msra.gmra.mxu1 %vm199_vm0, %v943_v9 }
 0x3de   : > { %v944_v13 = vmax.f32 %v913_v12, 0.0 }
 0x3df   : > { %v1573_v15 = vpop.f32.mrf.mxu0 }
 0x3e0   : > { %1588 = vmatprep.mubr.msk.f32.mxu1 %vm199_vm0, %v944_v13  ;;  %v947_v4 = vmax.f32 %v1573_v15, 0.0 }
 0x3e1   : > { %v923_v16 = vpop.f32.mrf.mxu0  ;;  %1589 = vmatmul.mubr.msk.f32.gmra.mxu1 %vm199_vm0, %v945_v14 }
 0x3e2   : > { %v946_v19 = vmax.f32 %v923_v16, 0.0 }
 0x3e3   : > { %v1576_v20 = vpop.f32.mrf.mxu0 }
 0x3e4   : > { %1591 = vmatprep.mubr.msk.f32.mxu1 %vm199_vm0, %v946_v19  ;;  %v949_v10 = vmax.f32 %v1576_v20, 0.0 }
 0x3e5   : > { %v933_v5 = vpop.f32.mrf.mxu0  ;;  %1592 = vmatmul.mubr.msk.f32.gmra.mxu1 %vm199_vm0, %v947_v4 }
 0x3e6   : > { %v948_v6 = vmax.f32 %v933_v5, 0.0 }
 0x3e8   : > { %1594 = vmatprep.mubr.msk.f32.mxu1 %vm199_vm0, %v948_v6 }
 0x3e9   : > { %1595 = vmatmul.mubr.msk.f32.gmra.mxu1 %vm199_vm0, %v949_v10 }
 0x3ea   : > { %1622 = vmatprep.mubr.msk.f32.mxu1 %vm565_vm1, %v1862_v37 }
 0x49d   : > { %v1587_v21 = vpop.f32.mrf.mxu1 }
 0x49f   : > { %v1045_v17 = vpop.f32.mrf.mxu1 }
 0x4a1   : > { %v1590_v22 = vpop.f32.mrf.mxu1 }
 0x4a3   : > { %v1055_v23 = vpop.f32.mrf.mxu1 }
 0x4a5   : > { %v1593_v24 = vpop.f32.mrf.mxu1 }
 0x4a7   : > { %v1065_v18 = vpop.f32.mrf.mxu1 }
 0x4a9   : > { %v1596_v27 = vpop.f32.mrf.mxu1 }
 0x4aa   : > { %1597 = vmatprep.subr.mxu0 %v1596_v27  ;;  %1625 = vmatprep.subr.mxu1 %v1596_v27 }
 0x4ab   : > { %v1075_v28 = vpop.f32.mrf.mxu1  ;;  %1598 = vmatpush3.msra.mxu0 %v1596_v27  ;;  %1633 = vmatpush3.msra.mxu1 %v1596_v27 }
 0x4ac   : > { %1599 = vmatprep.subr.mxu0 %v1075_v28  ;;  %1626 = vmatprep.subr.mxu1 %v1075_v28 }
 0x4ad   : > { %1600 = vmatpush3.msra.mxu0 %v1075_v28  ;;  %1634 = vmatpush3.msra.mxu1 %v1075_v28 }
 0x4ae   : > { %1601 = vmatprep.subr.mxu0 %v1593_v24  ;;  %1627 = vmatprep.subr.mxu1 %v1593_v24 }
 0x4af   : > { %1602 = vmatpush3.msra.mxu0 %v1593_v24  ;;  %1635 = vmatpush3.msra.mxu1 %v1593_v24 }
 0x4b0   : > { %1603 = vmatprep.subr.mxu0 %v1065_v18  ;;  %1628 = vmatprep.subr.mxu1 %v1065_v18 }
 0x4b1   : > { %1604 = vmatpush3.msra.mxu0 %v1065_v18  ;;  %1636 = vmatpush3.msra.mxu1 %v1065_v18 }
 0x4b2   : > { %1605 = vmatprep.subr.mxu0 %v1590_v22  ;;  %1629 = vmatprep.subr.mxu1 %v1590_v22 }
 0x4b3   : > { %1606 = vmatpush3.msra.mxu0 %v1590_v22  ;;  %1637 = vmatpush3.msra.mxu1 %v1590_v22 }
 0x4b4   : > { %1607 = vmatprep.subr.mxu0 %v1055_v23  ;;  %1630 = vmatprep.subr.mxu1 %v1055_v23 }
 0x4b5   : > { %1608 = vmatpush3.msra.mxu0 %v1055_v23  ;;  %1638 = vmatpush3.msra.mxu1 %v1055_v23 }
 0x4b6   : > { %1609 = vmatprep.subr.mxu0 %v1587_v21  ;;  %1631 = vmatprep.subr.mxu1 %v1587_v21 }
 0x4b7   : > { %1610 = vmatpush3.msra.mxu0 %v1587_v21  ;;  %1639 = vmatpush3.msra.mxu1 %v1587_v21 }
 0x4b8   : > { %1611 = vmatprep.subr.mxu0 %v1045_v17  ;;  %1632 = vmatprep.subr.mxu1 %v1045_v17 }
 0x4b9   : > { %1612 = vmatpush3.msra.mxu0 %v1045_v17  ;;  %1640 = vmatpush3.msra.mxu1 %v1045_v17 }
 0x4ba   : > { %1614 = vmatmul.mubr.msk.f32.vlgmr.msra.gmra.mxu0 %vm565_vm1, %v1828_v26  ;;  %1623 = vmatmul.mubr.msk.f32.vlgmr.msra.gmra.mxu1 %vm565_vm1, %v1858_v36 }
 0x4bb   : > { %1616 = vmatprep.mubr.msk.f32.mxu0 %vm565_vm1, %v1846_v33 }
 0x4be   : > { %1617 = vmatmul.mubr.msk.f32.gmra.mxu0 %vm565_vm1, %v1839_v31 }
 0x4bf   : > { %1619 = vmatprep.mubr.msk.f32.mxu0 %vm565_vm1, %v1854_v35 }
 0x4c2   : > { %1620 = vmatmul.mubr.msk.f32.gmra.mxu0 %vm565_vm1, %v1850_v34 }
 0x57a   : > { %v1615_v25 = vpop.f32.mrf.mxu0  ;;  %v1624_v26 = vpop.f32.mrf.mxu1 }
 0x57b   : > { %1191 = vst.msk [vmem:[%s190_s22 + $0x8] sm:$0xff] %vm1189_vm2, %v1615_v25  ;;  %1197 = vst.msk [vmem:[%s190_s22 + $0x38] sm:$0xff] %vm1189_vm2, %v1624_v26 }
 0x57c   : > { %v1150_v29 = vpop.f32.mrf.mxu0  ;;  %v1180_v30 = vpop.f32.mrf.mxu1 }
 0x57d   : > { %1190 = vst.msk [vmem:[%s190_s22] sm:$0xff] %vm1189_vm2, %v1150_v29  ;;  %1196 = vst.msk [vmem:[%s190_s22 + $0x30] sm:$0xff] %vm1189_vm2, %v1180_v30 }
 0x57e   : > { %v1618_v31 = vpop.f32.mrf.mxu0 }
 0x57f   : > { %1193 = vst.msk [vmem:[%s190_s22 + $0x18] sm:$0xff] %vm1189_vm2, %v1618_v31 }
 0x580   : > { %v1160_v32 = vpop.f32.mrf.mxu0 }
 0x581   : > { %1192 = vst.msk [vmem:[%s190_s22 + $0x10] sm:$0xff] %vm1189_vm2, %v1160_v32 }
 0x582   : > { %v1621_v33 = vpop.f32.mrf.mxu0 }
 0x583   : > { %1195 = vst.msk [vmem:[%s190_s22 + $0x28] sm:$0xff] %vm1189_vm2, %v1621_v33 }
 0x584   : > { %v1170_v34 = vpop.f32.mrf.mxu0 }
 0x585   : > { %1194 = vst.msk [vmem:[%s190_s22 + $0x20] sm:$0xff] %vm1189_vm2, %v1170_v34 }
 0x586 PF: > { %s13_s12 = sadd.s32 1, %s1673_s12  }
 0x587   : > { %p10_p4 = scmp.ge.s32.totalorder %s13_s12, 6  }
 0x589   :  { %12 = sbr.rel (!%p10_p4) target bundleno = 1 (0x1), region = 67 }

</bundles_post_ra>
